<compile_context>
chip_gen: v7x
topology: tpu7x:2x2x1
jax: 0.10.0
libtpu: 0.0.40
codegen_flags: <defaults>
</compile_context>

<pallas_src>
import math
from functools import partial

import jax
import jax.numpy as jnp
from jax.experimental import pallas as pl
from jax.experimental.pallas import tpu as pltpu


def _drop_path_kernel(u_ref, x_ref, o_ref, *, keep_prob: float, scale: float):
    # u_ref block: (Bt, 1) uniforms in [0, 1); x_ref/o_ref block: (Bt, Lt).
    u = u_ref[...]                                            # (Bt, 1) f32
    # Keep sample with probability keep_prob; scale kept samples by `scale`.
    mask = jnp.where(u < keep_prob,
                     jnp.float32(scale), jnp.float32(0.0))    # (Bt, 1) f32
    o_ref[...] = (x_ref[...].astype(jnp.float32) * mask).astype(o_ref.dtype)


_TARGET_BLOCK_ELEMS = 512 * 1024      # ~2 MiB of f32 per x block
_MAX_LANE_TILE = 32768                # multiple of 128


def _pick_tiles(B: int, L: int):
    # Lane tile: full L if it fits, else a 128-aligned chunk (lane-dense).
    lt = L if L <= _MAX_LANE_TILE else _MAX_LANE_TILE
    # Row tile: as many samples as keep the block near the target size.
    max_rows = max(_TARGET_BLOCK_ELEMS // max(lt, 1), 8)
    if B <= max_rows:
        bt = B                               # full dim -> always a legal block dim
    else:
        bt = max((max_rows // 8) * 8, 8)     # multiple of 8 sublanes
    return bt, lt


def drop_path_forward(x, rng_key, *, drop_prob: float, training: bool,
                      scale_by_keep: bool = True):
    """DropPath forward. x: (B, ...) array; rng_key: jax PRNG key."""
    if drop_prob == 0.0 or not training:
        return x                             # identity path, same early-return as PyTorch

    keep_prob = 1.0 - drop_prob
    scale = (1.0 / keep_prob) if (scale_by_keep and keep_prob > 0.0) else 1.0

    B = x.shape[0]
    L = math.prod(x.shape[1:]) if x.ndim > 1 else 1
    x2 = x.reshape(B, L)

    # Per-sample uniforms (deterministic, counter-based RNG) -> thresholded in-kernel.
    u = jax.random.uniform(rng_key, (B, 1), dtype=jnp.float32)

    bt, lt = _pick_tiles(B, L)
    grid = (pl.cdiv(B, bt), pl.cdiv(L, lt))

    kernel = partial(_drop_path_kernel, keep_prob=keep_prob, scale=scale)

    out = pl.pallas_call(
        kernel,
        out_shape=jax.ShapeDtypeStruct((B, L), x.dtype),
        grid_spec=pltpu.PrefetchScalarGridSpec(
            num_scalar_prefetch=0,
            grid=grid,
            in_specs=[
                pl.BlockSpec((bt, 1), lambda i, j: (i, 0)),    # per-row mask inputs
                pl.BlockSpec((bt, lt), lambda i, j: (i, j)),   # x tile
            ],
            out_specs=pl.BlockSpec((bt, lt), lambda i, j: (i, j)),
        ),
        compiler_params=pltpu.CompilerParams(
            dimension_semantics=("parallel", "parallel"),
            vmem_limit_bytes=48 << 20),      # headroom for double-buffered ~2 MiB tiles
    )(u, x2)

    return out.reshape(x.shape)


def drop_path_reference(x, rng_key, *, drop_prob: float, training: bool,
                        scale_by_keep: bool = True):
    """Pure-JAX reference mirroring the PyTorch drop_path exactly
    (using the same uniform draw as the kernel wrapper)."""
    if drop_prob == 0.0 or not training:
        return x
    keep_prob = 1.0 - drop_prob
    scale = (1.0 / keep_prob) if (scale_by_keep and keep_prob > 0.0) else 1.0
    B = x.shape[0]
    u = jax.random.uniform(rng_key, (B, 1), dtype=jnp.float32)
    mask = jnp.where(u < keep_prob, jnp.float32(scale), jnp.float32(0.0))
    mask = mask.reshape((B,) + (1,) * (x.ndim - 1))
    return (x.astype(jnp.float32) * mask).astype(x.dtype)


if __name__ == "__main__":
    # Small shapes consistent with the ViT-for-time-series usage:
    # batch=8 samples, seq=8 tokens, hidden=32 (flattened lane dim = 256).
    B, N, C = 8, 8, 32
    drop_prob = 0.25

    key = jax.random.PRNGKey(0)
    kx, kmask = jax.random.split(key)
    x = jax.random.normal(kx, (B, N, C), dtype=jnp.float32)

    # Training path (stochastic depth active, scaled by 1/keep_prob).
    out = drop_path_forward(x, kmask, drop_prob=drop_prob, training=True,
                            scale_by_keep=True)
    out = jax.block_until_ready(out)
    ref = drop_path_reference(x, kmask, drop_prob=drop_prob, training=True,
                              scale_by_keep=True)
    assert out.shape == x.shape
    assert jnp.allclose(out, ref, atol=1e-6, rtol=1e-6), "mismatch vs reference"

    # Training path without rescaling.
    out2 = drop_path_forward(x, kmask, drop_prob=drop_prob, training=True,
                             scale_by_keep=False)
    out2 = jax.block_until_ready(out2)
    ref2 = drop_path_reference(x, kmask, drop_prob=drop_prob, training=True,
                               scale_by_keep=False)
    assert jnp.allclose(out2, ref2, atol=1e-6, rtol=1e-6), "mismatch (no rescale)"

    # Identity paths: drop_prob == 0 and eval mode.
    out3 = drop_path_forward(x, kmask, drop_prob=0.0, training=True)
    out4 = drop_path_forward(x, kmask, drop_prob=drop_prob, training=False)
    assert jnp.allclose(jax.block_until_ready(out3), x)
    assert jnp.allclose(jax.block_until_ready(out4), x)

    print("KERNEL_OK")
</pallas_src>

<mosaic_0001>
module attributes {stable_mosaic.version = 11 : i64} {
  func.func @_drop_path_kernel(%arg0: i32, %arg1: i32, %arg2: memref<8x1xf32, #tpu.memory_space<vmem>>, %arg3: memref<8x256xf32, #tpu.memory_space<vmem>>, %arg4: memref<8x256xf32, #tpu.memory_space<vmem>>) attributes {dimension_semantics = [#tpu.dimension_semantics<parallel>, #tpu.dimension_semantics<parallel>], iteration_bounds = array<i64: 1, 1>, scalar_prefetch = 0 : i64, scratch_operands = 0 : i64, tpu.core_type = #tpu.core_type<tc>, window_params = [{transform_indices = @transform_0, window_bounds = array<i64: 8, 1>}, {transform_indices = @transform_1, window_bounds = array<i64: 8, 256>}, {transform_indices = @transform_2, window_bounds = array<i64: 8, 256>}]} {
    %c0 = arith.constant 0 : index
    %c0_0 = arith.constant 0 : index
    %0 = vector.load %arg2[%c0, %c0_0] : memref<8x1xf32, #tpu.memory_space<vmem>>, vector<8x1xf32>
    %cst = arith.constant 7.500000e-01 : f32
    %1 = vector.broadcast %cst : f32 to vector<8x1xf32>
    %2 = arith.cmpf olt, %0, %1 : vector<8x1xf32>
    %cst_1 = arith.constant 1.33333337 : f32
    %cst_2 = arith.constant 0.000000e+00 : f32
    %3 = vector.broadcast %cst_1 : f32 to vector<8x1xf32>
    %4 = vector.broadcast %cst_2 : f32 to vector<8x1xf32>
    %5 = arith.select %2, %3, %4 : vector<8x1xi1>, vector<8x1xf32>
    %c0_3 = arith.constant 0 : index
    %c0_4 = arith.constant 0 : index
    %6 = vector.load %arg3[%c0_3, %c0_4] : memref<8x256xf32, #tpu.memory_space<vmem>>, vector<8x256xf32>
    %7 = vector.broadcast %5 : vector<8x1xf32> to vector<8x256xf32>
    %8 = arith.mulf %6, %7 : vector<8x256xf32>
    %c0_5 = arith.constant 0 : index
    %c0_6 = arith.constant 0 : index
    %9 = vector.load %arg4[%c0_5, %c0_6] : memref<8x256xf32, #tpu.memory_space<vmem>>, vector<8x256xf32>
    tpu.vector_store %arg4[%c0_5, %c0_6], %8 {strides = array<i32>} : memref<8x256xf32, #tpu.memory_space<vmem>>, vector<8x256xf32>,
    return
  }
  func.func @transform_0(%arg0: i32, %arg1: i32) -> (i32, i32) {
    %c0_i32 = arith.constant 0 : i32
    %c0_i32_0 = arith.constant 0 : i32
    return %arg0, %c0_i32 : i32, i32
  }
  func.func @transform_1(%arg0: i32, %arg1: i32) -> (i32, i32) {
    %c0_i32 = arith.constant 0 : i32
    return %arg0, %arg1 : i32, i32
  }
  func.func @transform_2(%arg0: i32, %arg1: i32) -> (i32, i32) {
    %c0_i32 = arith.constant 0 : i32
    return %arg0, %arg1 : i32, i32
  }
}

</mosaic_0001>

<bundles_post_ra>
// kernel: tpu_custom_call.1
= control target key start
LH: loop header
LB: loop body
LE: loop exit
PB: predicated region body
PF: predicated region fallthrough
CT: control target
= control target key end

     0   :  { %7 = vsyncpa [#allocation3], 0  ;;  %s152_s0 = inlined_call_operand.vmem [shape: f32[8,1], index: 0, kind: input, shape index: {}]   ;;  %s153_s1 = inlined_call_operand.hbm [shape: f32[8,256], index: 1, kind: input, shape index: {}]   ;;  %s154_s2 = inlined_call_operand.hbm [shape: f32[8,256], index: 2, kind: output, shape index: {}]  }
   0x1   :  { %8 = vsyncpa [#allocation4], 0  ;;  %s106_s9 = smov [#allocation2]   ;;  %s58_s13 = scalar_lea.hbm %s153_s1, 256 }
   0x2   :  { %s17_s10 = sshll.u32 %s106_s9, 4  ;;  %p59_p0 = scmp.ne.s32.totalorder %s153_s1, %s58_s13  ;;  %s18_s10 = int_to_ptr.vmem [resolvable:$true] %s17_s10 }
   0x3   :  { %p62_p1 = scmp.lt.u32.totalorder %s58_s13, %s153_s1 }
   0x5   :  { %p64_p2 = pnand %p62_p1, %p59_p0 }
   0x7   :  { %67 = shalt.err (!%p64_p2)
}
   0x8   :  { %s68_s18 = scalar_lea.vmem %s18_s10, 256  ;;  %p73_p4 = scmp.lt.s32.totalorder %s18_s10, %s18_s10 }
   0x9   :  { %p69_p3 = scmp.ne.s32.totalorder %s18_s10, %s68_s18  ;;  %p74_p5 = scmp.lt.s32.totalorder %s68_s18, %s68_s18 }
   0xb   :  { %p75_p6 = por %p74_p5, %p73_p4 }
   0xd   :  { %p76_p7 = pnand %p75_p6, %p69_p3 }
   0xf   :  { %79 = shalt.err (!%p76_p7)
}
  0x10   :  { %20 = dma.hbm_to_vmem [thread:$0]  %s153_s1, 256, %s18_s10, [#allocation3]  }
  0x11   :  { %102 = dma.done.wait [#allocation3], 256  }
  0x12   :  { %103 = vsyncadd [#allocation3], 4294967040  ;;  %v107_v0 = vmov 0   ;;  %v24_v1 = vld [vmem:[%s152_s0] sm:$0xff]  ;;  %v108_v2 = vmov 0.0   ;;  %v28_v5 = vld [vmem:[#allocation2 + $0x8] sm:$0xff] }
  0x13   :  { %57 = vset.pattern.permute.xlu0 %v107_v0  ;;  %vm25_vm0 = vcmp.lt.f32.partialorder %v24_v1, 0.75  ;;  %v27_v4 = vld [vmem:[#allocation2] sm:$0xff]  ;;  %s109_s23 = smov [#allocation5]  }
  0x14   :  { %v26_v3 = vsel %vm25_vm0, 1.3333334, %v108_v2  ;;  %s44_s24 = sshll.u32 %s109_s23, 4  ;;  %s45_s24 = int_to_ptr.vmem [resolvable:$true] %s44_s24 }
  0x15   :  { %31 = vperm.xlu0 %57, %v26_v3   ;;  %s80_s1 = scalar_lea.vmem %s45_s24, 256  ;;  %p85_p9 = scmp.lt.s32.totalorder %s45_s24, %s45_s24 }
  0x16   :  { %p81_p8 = scmp.ne.s32.totalorder %s45_s24, %s80_s1  ;;  %p86_p10 = scmp.lt.s32.totalorder %s80_s1, %s80_s1 }
  0x18   :  { %p87_p11 = por %p86_p10, %p85_p9 }
  0x1a   :  { %p88_p12 = pnand %p87_p11, %p81_p8 }
  0x94   :  { %v32_v6 = vpop.permute.xlu0 %31 }
  0x95   :  { %v34_v7 = vmul.f32 %v32_v6, %v27_v4  ;;  %v35_v8 = vmul.f32 %v32_v6, %v28_v5 }
  0x97   :  { %36 = vst [vmem:[#allocation5] sm:$0xff] %v34_v7  ;;  %37 = vst [vmem:[#allocation5 + $0x8] sm:$0xff] %v35_v8 }
  0x98   :  { %91 = shalt.err (!%p88_p12)
}
  0x99   :  { %s92_s26 = scalar_lea.hbm %s154_s2, 256 }
  0x9a   :  { %p93_p13 = scmp.ne.s32.totalorder %s154_s2, %s92_s26  ;;  %p96_p0 = scmp.lt.u32.totalorder %s92_s26, %s154_s2 }
  0x9c   :  { %p98_p1 = pnand %p96_p0, %p93_p13 }
  0x9e   :  { %101 = shalt.err (!%p98_p1)
}
  0x9f   :  { %47 = dma.vmem_to_hbm [thread:$0]  %s45_s24, 256, %s154_s2, [#allocation4]  }
  0xa0   :  { %104 = dma.done.wait [#allocation4], 256  }
  0xa1   :  { %105 = vsyncadd [#allocation4], 4294967040 }
  0xa2   :  { %51 = vsyncpa [#allocation3], 1 }
  0xa3   :  { %52 = vsyncpa [#allocation4], 1 }

</bundles_post_ra>
